<compile_context>
chip_gen: v7x
topology: tpu7x:2x2x1
jax: 0.10.0
libtpu: 0.0.40
codegen_flags: <defaults>
</compile_context>

<pallas_src>
import functools

import jax
import jax.numpy as jnp
from jax.experimental import pallas as pl
from jax.experimental.pallas import tpu as pltpu


# Set True on v6e/v7x to feed the MXU bf16 operands (f32 accumulation kept).
# Left False here so the exact-f32 correctness check below is tight.
USE_BF16_MXU = False


def _dense_bottleneck_kernel(x_ref, s1_ref, b1_ref, w1_ref, b2_ref, w2_ref,
                             o_ref, *, H, W, growth, use_bf16):
    """One batch element per grid step.

    x_ref  : (1, C_in, H*W)        input, channels on sublanes, pixels on lanes
    s1_ref : (C_in, 1)             folded BN1 scale
    b1_ref : (C_in, 1)             folded BN1 shift
    w1_ref : (C_inner, C_in)       1x1 conv weight with BN2 scale folded in
    b2_ref : (C_inner, 1)          folded BN2 shift
    w2_ref : (9, growth, C_inner)  3x3 conv weight, one (growth, C_inner) per tap
    o_ref  : (1, C_in+growth, H*W) [shortcut ; residual] along channels
    """
    HW = H * W
    C_inner = w1_ref.shape[0]
    mm = jnp.bfloat16 if use_bf16 else jnp.float32

    x = x_ref[0]                                           # (C_in, HW)
    xf = x.astype(jnp.float32)

    # --- BN1 + ReLU (per-channel affine, pre-folded in the wrapper) ----------
    a1 = jnp.maximum(xf * s1_ref[...] + b1_ref[...], 0.0)  # (C_in, HW)

    # --- 1x1 conv (BN2 scale folded into w1) + BN2 shift + ReLU  (MXU) -------
    h = jnp.dot(w1_ref[...].astype(mm), a1.astype(mm),
                preferred_element_type=jnp.float32) + b2_ref[...]   # (C_inner, HW)
    a2 = jnp.maximum(h, 0.0)

    # --- 3x3 conv (padding=1) as 9 accumulated tap matmuls (MXU) -------------
    # Flat row-major layout: pixel p = i*W + j on the lane axis.  A (W+1)-wide
    # zero pad on each side makes every vertical (+/-W) shift read zeros outside
    # the image; horizontal (+/-1) shifts that would wrap across a row edge are
    # zeroed with a per-column mask.
    zpad = jnp.zeros((C_inner, W + 1), jnp.float32)
    a2p = jnp.concatenate([zpad, a2, zpad], axis=1)        # (C_inner, HW + 2W + 2)

    col = jax.lax.broadcasted_iota(jnp.int32, (1, HW), 1) % W
    col_ok_left = col >= 1          # tap looks one column to the left
    col_ok_right = col <= W - 2     # tap looks one column to the right

    acc = jnp.zeros((growth, HW), jnp.float32)             # small: stays in vregs
    for k in range(9):                                     # unrolled static taps
        di, dj = k // 3 - 1, k % 3 - 1
        start = (W + 1) + di * W + dj                      # static lane offset
        shifted = a2p[:, start:start + HW]                 # (C_inner, HW)
        if dj == -1:
            shifted = jnp.where(col_ok_left, shifted, 0.0)
        elif dj == 1:
            shifted = jnp.where(col_ok_right, shifted, 0.0)
        acc = acc + jnp.dot(w2_ref[k].astype(mm), shifted.astype(mm),
                            preferred_element_type=jnp.float32)    # (growth, HW)

    # --- fused shortcut concat: [x ; residual] along the channel axis --------
    o_ref[...] = jnp.concatenate([xf, acc], axis=0)[None].astype(o_ref.dtype)


def dense_bottleneck(x, params, *, eps=1e-5, use_bf16=USE_BF16_MXU):
    """Matches DenseBottleNeck.forward (inference-mode BatchNorm, ReLU activation).

    x      : (N, C_in, H, W)  NCHW input
    params : (gamma1, beta1, mean1, var1, conv1_w, gamma2, beta2, mean2, var2, conv2_w)
             conv1_w: (C_inner, C_in, 1, 1), conv2_w: (growth, C_inner, 3, 3)
    returns: (N, C_in + growth, H, W)
    """
    (g1, be1, m1, v1, w1, g2, be2, m2, v2, w2) = params
    N, C_in, H, W = map(int, x.shape)
    C_inner = int(w1.shape[0])
    growth = int(w2.shape[0])
    HW = H * W

    # TODO(synk): train-mode BatchNorm (batch statistics) would need an extra
    # cross-batch reduction pass; this implements the standard inference-mode BN.
    s1 = g1 / jnp.sqrt(v1 + eps)
    b1 = be1 - m1 * s1
    s2 = g2 / jnp.sqrt(v2 + eps)
    b2 = be2 - m2 * s2
    # BN2's scale commutes with the (linear) 1x1 conv -> fold into its weights.
    w1f = w1[:, :, 0, 0] * s2[:, None]                          # (C_inner, C_in)
    # 3x3 weights repacked per tap: w2r[k] = w2[:, :, k//3, k%3] -> (growth, C_inner)
    w2r = jnp.transpose(w2, (2, 3, 0, 1)).reshape(9, growth, C_inner)

    x_flat = x.reshape(N, C_in, HW)      # NCHW with spatial flattened (free reshape)

    kernel = functools.partial(_dense_bottleneck_kernel, H=H, W=W,
                               growth=growth, use_bf16=use_bf16)

    out_flat = pl.pallas_call(
        kernel,
        out_shape=jax.ShapeDtypeStruct((N, C_in + growth, HW), x.dtype),
        grid_spec=pltpu.PrefetchScalarGridSpec(
            num_scalar_prefetch=0,
            grid=(N,),                   # one image per step; weights stay resident
            in_specs=[
                pl.BlockSpec((1, C_in, HW), lambda n: (n, 0, 0)),
                pl.BlockSpec((C_in, 1), lambda n: (0, 0)),
                pl.BlockSpec((C_in, 1), lambda n: (0, 0)),
                pl.BlockSpec((C_inner, C_in), lambda n: (0, 0)),
                pl.BlockSpec((C_inner, 1), lambda n: (0, 0)),
                pl.BlockSpec((9, growth, C_inner), lambda n: (0, 0, 0)),
            ],
            out_specs=pl.BlockSpec((1, C_in + growth, HW), lambda n: (n, 0, 0)),
        ),
        compiler_params=pltpu.CompilerParams(
            dimension_semantics=("parallel",),   # batch steps shard across TCs
        ),
    )(x_flat, s1[:, None], b1[:, None], w1f, b2[:, None], w2r)

    return out_flat.reshape(N, C_in + growth, H, W)


def _reference_dense_bottleneck(x, params, *, eps=1e-5):
    """Pure-JAX reference with the same (inference-mode BN) semantics."""
    (g1, be1, m1, v1, w1, g2, be2, m2, v2, w2) = params

    def bn(t, g, b, m, v):
        scale = (g / jnp.sqrt(v + eps))[None, :, None, None]
        return (t - m[None, :, None, None]) * scale + b[None, :, None, None]

    a1 = jax.nn.relu(bn(x, g1, be1, m1, v1))
    h = jax.lax.conv_general_dilated(
        a1, w1, window_strides=(1, 1), padding="VALID",
        dimension_numbers=("NCHW", "OIHW", "NCHW"),
        precision=jax.lax.Precision.HIGHEST)
    a2 = jax.nn.relu(bn(h, g2, be2, m2, v2))
    r = jax.lax.conv_general_dilated(
        a2, w2, window_strides=(1, 1), padding=((1, 1), (1, 1)),
        dimension_numbers=("NCHW", "OIHW", "NCHW"),
        precision=jax.lax.Precision.HIGHEST)
    return jnp.concatenate([x, r], axis=1)


if __name__ == "__main__":
    # DenseBottleNeck(in_channels=4, growth_rate=8, expansion_rate=4) at small shapes:
    # inner_channels = 32, residual adds 8 channels, output has 4 + 8 = 12 channels.
    # (droprate is stored but unused in the module's forward; activation = ReLU.)
    in_channels, growth_rate, expansion_rate = 4, 8, 4
    inner_channels = expansion_rate * growth_rate
    N, H, W = 2, 16, 16

    key = jax.random.PRNGKey(0)
    keys = jax.random.split(key, 11)

    x = jax.random.normal(keys[0], (N, in_channels, H, W), dtype=jnp.float32)

    g1 = 1.0 + 0.1 * jax.random.normal(keys[1], (in_channels,), jnp.float32)
    be1 = 0.1 * jax.random.normal(keys[2], (in_channels,), jnp.float32)
    m1 = 0.1 * jax.random.normal(keys[3], (in_channels,), jnp.float32)
    v1 = 0.5 + jax.random.uniform(keys[4], (in_channels,), jnp.float32)
    w1 = 0.2 * jax.random.normal(keys[5], (inner_channels, in_channels, 1, 1),
                                 jnp.float32)
    g2 = 1.0 + 0.1 * jax.random.normal(keys[6], (inner_channels,), jnp.float32)
    be2 = 0.1 * jax.random.normal(keys[7], (inner_channels,), jnp.float32)
    m2 = 0.1 * jax.random.normal(keys[8], (inner_channels,), jnp.float32)
    v2 = 0.5 + jax.random.uniform(keys[9], (inner_channels,), jnp.float32)
    w2 = 0.1 * jax.random.normal(keys[10], (growth_rate, inner_channels, 3, 3),
                                 jnp.float32)

    params = (g1, be1, m1, v1, w1, g2, be2, m2, v2, w2)

    out = dense_bottleneck(x, params)
    out = jax.block_until_ready(out)

    ref = _reference_dense_bottleneck(x, params)
    ref = jax.block_until_ready(ref)

    assert out.shape == (N, in_channels + growth_rate, H, W), out.shape
    # f32 accumulation in-kernel; tolerance leaves margin for MXU f32-pass /
    # summation-order differences vs. the XLA reference conv (observed ~1e-6).
    max_err = float(jnp.max(jnp.abs(out - ref)))
    assert jnp.allclose(out, ref, atol=5e-3, rtol=5e-3), max_err

    print("KERNEL_OK")
</pallas_src>

<mosaic_0001>
module attributes {stable_mosaic.version = 11 : i64} {
  func.func @_dense_bottleneck_kernel(%arg0: i32, %arg1: memref<1x4x256xf32, #tpu.memory_space<vmem>>, %arg2: memref<4x1xf32, #tpu.memory_space<vmem>>, %arg3: memref<4x1xf32, #tpu.memory_space<vmem>>, %arg4: memref<32x4xf32, #tpu.memory_space<vmem>>, %arg5: memref<32x1xf32, #tpu.memory_space<vmem>>, %arg6: memref<9x8x32xf32, #tpu.memory_space<vmem>>, %arg7: memref<1x12x256xf32, #tpu.memory_space<vmem>>) attributes {dimension_semantics = [#tpu.dimension_semantics<parallel>], iteration_bounds = array<i64: 2>, scalar_prefetch = 0 : i64, scratch_operands = 0 : i64, tpu.core_type = #tpu.core_type<tc>, window_params = [{transform_indices = @transform_0, window_bounds = array<i64: 1, 4, 256>}, {pipeline_mode = #tpu.pipeline_mode<synchronous>, transform_indices = @transform_1, window_bounds = array<i64: 4, 1>}, {pipeline_mode = #tpu.pipeline_mode<synchronous>, transform_indices = @transform_2, window_bounds = array<i64: 4, 1>}, {pipeline_mode = #tpu.pipeline_mode<synchronous>, transform_indices = @transform_3, window_bounds = array<i64: 32, 4>}, {pipeline_mode = #tpu.pipeline_mode<synchronous>, transform_indices = @transform_4, window_bounds = array<i64: 32, 1>}, {pipeline_mode = #tpu.pipeline_mode<synchronous>, transform_indices = @transform_5, window_bounds = array<i64: 9, 8, 32>}, {transform_indices = @transform_6, window_bounds = array<i64: 1, 12, 256>}]} {
    %c0 = arith.constant 0 : index
    %c0_0 = arith.constant 0 : index
    %c0_1 = arith.constant 0 : index
    %0 = vector.load %arg1[%c0, %c0_0, %c0_1] : memref<1x4x256xf32, #tpu.memory_space<vmem>>, vector<1x4x256xf32>
    %1 = vector.shape_cast %0 : vector<1x4x256xf32> to vector<4x256xf32>
    %c0_2 = arith.constant 0 : index
    %c0_3 = arith.constant 0 : index
    %2 = vector.load %arg2[%c0_2, %c0_3] : memref<4x1xf32, #tpu.memory_space<vmem>>, vector<4x1xf32>
    %3 = vector.broadcast %2 : vector<4x1xf32> to vector<4x256xf32>
    %4 = arith.mulf %1, %3 : vector<4x256xf32>
    %c0_4 = arith.constant 0 : index
    %c0_5 = arith.constant 0 : index
    %5 = vector.load %arg3[%c0_4, %c0_5] : memref<4x1xf32, #tpu.memory_space<vmem>>, vector<4x1xf32>
    %6 = vector.broadcast %5 : vector<4x1xf32> to vector<4x256xf32>
    %7 = arith.addf %4, %6 : vector<4x256xf32>
    %cst = arith.constant 0.000000e+00 : f32
    %8 = vector.broadcast %cst : f32 to vector<4x256xf32>
    %9 = arith.maximumf %7, %8 : vector<4x256xf32>
    %c0_6 = arith.constant 0 : index
    %c0_7 = arith.constant 0 : index
    %10 = vector.load %arg4[%c0_6, %c0_7] : memref<32x4xf32, #tpu.memory_space<vmem>>, vector<32x4xf32>
    %cst_8 = arith.constant dense<0.000000e+00> : vector<32x256xf32>
    %11 = tpu.matmul %10, %9, %cst_8 {dimension_numbers = #tpu.dot_dimension_numbers<[1], [0], [0], [1], [0, 0, 1, 1], [], []>} : vector<32x4xf32>, vector<4x256xf32>, vector<32x256xf32> -> vector<32x256xf32>
    %c0_9 = arith.constant 0 : index
    %c0_10 = arith.constant 0 : index
    %12 = vector.load %arg5[%c0_9, %c0_10] : memref<32x1xf32, #tpu.memory_space<vmem>>, vector<32x1xf32>
    %13 = vector.broadcast %12 : vector<32x1xf32> to vector<32x256xf32>
    %14 = arith.addf %11, %13 : vector<32x256xf32>
    %cst_11 = arith.constant 0.000000e+00 : f32
    %15 = vector.broadcast %cst_11 : f32 to vector<32x256xf32>
    %16 = arith.maximumf %14, %15 : vector<32x256xf32>
    %cst_12 = arith.constant 0.000000e+00 : f32
    %17 = vector.broadcast %cst_12 : f32 to vector<32x17xf32>
    %18 = tpu.concatenate %17, %16, %17 in 1 : vector<32x17xf32>, vector<32x256xf32>, vector<32x17xf32> -> vector<32x290xf32>
    %19 = tpu.iota {dimensions = array<i32: 1>} : vector<1x256xi32>
    %c16_i32 = arith.constant 16 : i32
    %c0_i32 = arith.constant 0 : i32
    %20 = arith.cmpi eq, %c16_i32, %c0_i32 : i32
    %c1_i32 = arith.constant 1 : i32
    %21 = arith.select %20, %c1_i32, %c16_i32 : i32
    %22 = vector.broadcast %21 : i32 to vector<1x256xi32>
    %23 = arith.remsi %19, %22 : vector<1x256xi32>
    %c0_i32_13 = arith.constant 0 : i32
    %24 = vector.broadcast %c0_i32_13 : i32 to vector<1x256xi32>
    %25 = arith.cmpi ne, %23, %24 : vector<1x256xi32>
    %c0_i32_14 = arith.constant 0 : i32
    %26 = vector.broadcast %c0_i32_14 : i32 to vector<1x256xi32>
    %27 = arith.cmpi slt, %23, %26 : vector<1x256xi32>
    %c0_i32_15 = arith.constant 0 : i32
    %28 = arith.cmpi slt, %21, %c0_i32_15 : i32
    %29 = vector.broadcast %28 : i1 to vector<1x256xi1>
    %30 = vector.broadcast %29 : vector<1x256xi1> to vector<1x256xi1>
    %31 = arith.xori %27, %30 : vector<1x256xi1>
    %32 = arith.andi %31, %25 : vector<1x256xi1>
    %33 = vector.broadcast %21 : i32 to vector<1x256xi32>
    %34 = arith.addi %23, %33 : vector<1x256xi32>
    %35 = arith.select %32, %34, %23 : vector<1x256xi1>, vector<1x256xi32>
    %c1_i32_16 = arith.constant 1 : i32
    %36 = vector.broadcast %c1_i32_16 : i32 to vector<1x256xi32>
    %37 = arith.cmpi sge, %35, %36 : vector<1x256xi32>
    %c14_i32 = arith.constant 14 : i32
    %38 = vector.broadcast %c14_i32 : i32 to vector<1x256xi32>
    %39 = arith.cmpi sle, %35, %38 : vector<1x256xi32>
    %cst_17 = arith.constant 0.000000e+00 : f32
    %40 = vector.broadcast %cst_17 : f32 to vector<8x256xf32>
    %41 = vector.extract_strided_slice %18 {offsets = [0, 0], sizes = [32, 256], strides = [1, 1]} : vector<32x290xf32> to vector<32x256xf32>
    %cst_18 = arith.constant 0.000000e+00 : f32
    %42 = vector.shape_cast %37 : vector<1x256xi1> to vector<1x256xi1>
    %43 = vector.broadcast %42 : vector<1x256xi1> to vector<32x256xi1>
    %44 = vector.broadcast %cst_18 : f32 to vector<32x256xf32>
    %45 = arith.select %43, %41, %44 : vector<32x256xi1>, vector<32x256xf32>
    %c0_19 = arith.constant 0 : index
    %c0_20 = arith.constant 0 : index
    %c0_21 = arith.constant 0 : index
    %46 = vector.load %arg6[%c0_19, %c0_20, %c0_21] : memref<9x8x32xf32, #tpu.memory_space<vmem>>, vector<1x8x32xf32>
    %47 = vector.shape_cast %46 : vector<1x8x32xf32> to vector<8x32xf32>
    %cst_22 = arith.constant dense<0.000000e+00> : vector<8x256xf32>
    %48 = tpu.matmul %47, %45, %cst_22 {dimension_numbers = #tpu.dot_dimension_numbers<[1], [0], [0], [1], [0, 0, 1, 1], [], []>} : vector<8x32xf32>, vector<32x256xf32>, vector<8x256xf32> -> vector<8x256xf32>
    %49 = arith.addf %40, %48 : vector<8x256xf32>
    %50 = vector.extract_strided_slice %18 {offsets = [0, 1], sizes = [32, 256], strides = [1, 1]} : vector<32x290xf32> to vector<32x256xf32>
    %c1 = arith.constant 1 : index
    %c0_23 = arith.constant 0 : index
    %c0_24 = arith.constant 0 : index
    %51 = vector.load %arg6[%c1, %c0_23, %c0_24] : memref<9x8x32xf32, #tpu.memory_space<vmem>>, vector<1x8x32xf32>
    %52 = vector.shape_cast %51 : vector<1x8x32xf32> to vector<8x32xf32>
    %cst_25 = arith.constant dense<0.000000e+00> : vector<8x256xf32>
    %53 = tpu.matmul %52, %50, %cst_25 {dimension_numbers = #tpu.dot_dimension_numbers<[1], [0], [0], [1], [0, 0, 1, 1], [], []>} : vector<8x32xf32>, vector<32x256xf32>, vector<8x256xf32> -> vector<8x256xf32>
    %54 = arith.addf %49, %53 : vector<8x256xf32>
    %55 = vector.extract_strided_slice %18 {offsets = [0, 2], sizes = [32, 256], strides = [1, 1]} : vector<32x290xf32> to vector<32x256xf32>
    %cst_26 = arith.constant 0.000000e+00 : f32
    %56 = vector.shape_cast %39 : vector<1x256xi1> to vector<1x256xi1>
    %57 = vector.broadcast %56 : vector<1x256xi1> to vector<32x256xi1>
    %58 = vector.broadcast %cst_26 : f32 to vector<32x256xf32>
    %59 = arith.select %57, %55, %58 : vector<32x256xi1>, vector<32x256xf32>
    %c2 = arith.constant 2 : index
    %c0_27 = arith.constant 0 : index
    %c0_28 = arith.constant 0 : index
    %60 = vector.load %arg6[%c2, %c0_27, %c0_28] : memref<9x8x32xf32, #tpu.memory_space<vmem>>, vector<1x8x32xf32>
    %61 = vector.shape_cast %60 : vector<1x8x32xf32> to vector<8x32xf32>
    %cst_29 = arith.constant dense<0.000000e+00> : vector<8x256xf32>
    %62 = tpu.matmul %61, %59, %cst_29 {dimension_numbers = #tpu.dot_dimension_numbers<[1], [0], [0], [1], [0, 0, 1, 1], [], []>} : vector<8x32xf32>, vector<32x256xf32>, vector<8x256xf32> -> vector<8x256xf32>
    %63 = arith.addf %54, %62 : vector<8x256xf32>
    %64 = vector.extract_strided_slice %18 {offsets = [0, 16], sizes = [32, 256], strides = [1, 1]} : vector<32x290xf32> to vector<32x256xf32>
    %cst_30 = arith.constant 0.000000e+00 : f32
    %65 = vector.shape_cast %37 : vector<1x256xi1> to vector<1x256xi1>
    %66 = vector.broadcast %65 : vector<1x256xi1> to vector<32x256xi1>
    %67 = vector.broadcast %cst_30 : f32 to vector<32x256xf32>
    %68 = arith.select %66, %64, %67 : vector<32x256xi1>, vector<32x256xf32>
    %c3 = arith.constant 3 : index
    %c0_31 = arith.constant 0 : index
    %c0_32 = arith.constant 0 : index
    %69 = vector.load %arg6[%c3, %c0_31, %c0_32] : memref<9x8x32xf32, #tpu.memory_space<vmem>>, vector<1x8x32xf32>
    %70 = vector.shape_cast %69 : vector<1x8x32xf32> to vector<8x32xf32>
    %cst_33 = arith.constant dense<0.000000e+00> : vector<8x256xf32>
    %71 = tpu.matmul %70, %68, %cst_33 {dimension_numbers = #tpu.dot_dimension_numbers<[1], [0], [0], [1], [0, 0, 1, 1], [], []>} : vector<8x32xf32>, vector<32x256xf32>, vector<8x256xf32> -> vector<8x256xf32>
    %72 = arith.addf %63, %71 : vector<8x256xf32>
    %73 = vector.extract_strided_slice %18 {offsets = [0, 17], sizes = [32, 256], strides = [1, 1]} : vector<32x290xf32> to vector<32x256xf32>
    %c4 = arith.constant 4 : index
    %c0_34 = arith.constant 0 : index
    %c0_35 = arith.constant 0 : index
    %74 = vector.load %arg6[%c4, %c0_34, %c0_35] : memref<9x8x32xf32, #tpu.memory_space<vmem>>, vector<1x8x32xf32>
    %75 = vector.shape_cast %74 : vector<1x8x32xf32> to vector<8x32xf32>
    %cst_36 = arith.constant dense<0.000000e+00> : vector<8x256xf32>
    %76 = tpu.matmul %75, %73, %cst_36 {dimension_numbers = #tpu.dot_dimension_numbers<[1], [0], [0], [1], [0, 0, 1, 1], [], []>} : vector<8x32xf32>, vector<32x256xf32>, vector<8x256xf32> -> vector<8x256xf32>
    %77 = arith.addf %72, %76 : vector<8x256xf32>
    %78 = vector.extract_strided_slice %18 {offsets = [0, 18], sizes = [32, 256], strides = [1, 1]} : vector<32x290xf32> to vector<32x256xf32>
    %cst_37 = arith.constant 0.000000e+00 : f32
    %79 = vector.shape_cast %39 : vector<1x256xi1> to vector<1x256xi1>
    %80 = vector.broadcast %79 : vector<1x256xi1> to vector<32x256xi1>
    %81 = vector.broadcast %cst_37 : f32 to vector<32x256xf32>
    %82 = arith.select %80, %78, %81 : vector<32x256xi1>, vector<32x256xf32>
    %c5 = arith.constant 5 : index
    %c0_38 = arith.constant 0 : index
    %c0_39 = arith.constant 0 : index
    %83 = vector.load %arg6[%c5, %c0_38, %c0_39] : memref<9x8x32xf32, #tpu.memory_space<vmem>>, vector<1x8x32xf32>
    %84 = vector.shape_cast %83 : vector<1x8x32xf32> to vector<8x32xf32>
    %cst_40 = arith.constant dense<0.000000e+00> : vector<8x256xf32>
    %85 = tpu.matmul %84, %82, %cst_40 {dimension_numbers = #tpu.dot_dimension_numbers<[1], [0], [0], [1], [0, 0, 1, 1], [], []>} : vector<8x32xf32>, vector<32x256xf32>, vector<8x256xf32> -> vector<8x256xf32>
    %86 = arith.addf %77, %85 : vector<8x256xf32>
    %87 = vector.extract_strided_slice %18 {offsets = [0, 32], sizes = [32, 256], strides = [1, 1]} : vector<32x290xf32> to vector<32x256xf32>
    %cst_41 = arith.constant 0.000000e+00 : f32
    %88 = vector.shape_cast %37 : vector<1x256xi1> to vector<1x256xi1>
    %89 = vector.broadcast %88 : vector<1x256xi1> to vector<32x256xi1>
    %90 = vector.broadcast %cst_41 : f32 to vector<32x256xf32>
    %91 = arith.select %89, %87, %90 : vector<32x256xi1>, vector<32x256xf32>
    %c6 = arith.constant 6 : index
    %c0_42 = arith.constant 0 : index
    %c0_43 = arith.constant 0 : index
    %92 = vector.load %arg6[%c6, %c0_42, %c0_43] : memref<9x8x32xf32, #tpu.memory_space<vmem>>, vector<1x8x32xf32>
    %93 = vector.shape_cast %92 : vector<1x8x32xf32> to vector<8x32xf32>
    %cst_44 = arith.constant dense<0.000000e+00> : vector<8x256xf32>
    %94 = tpu.matmul %93, %91, %cst_44 {dimension_numbers = #tpu.dot_dimension_numbers<[1], [0], [0], [1], [0, 0, 1, 1], [], []>} : vector<8x32xf32>, vector<32x256xf32>, vector<8x256xf32> -> vector<8x256xf32>
    %95 = arith.addf %86, %94 : vector<8x256xf32>
    %96 = vector.extract_strided_slice %18 {offsets = [0, 33], sizes = [32, 256], strides = [1, 1]} : vector<32x290xf32> to vector<32x256xf32>
    %c7 = arith.constant 7 : index
    %c0_45 = arith.constant 0 : index
    %c0_46 = arith.constant 0 : index
    %97 = vector.load %arg6[%c7, %c0_45, %c0_46] : memref<9x8x32xf32, #tpu.memory_space<vmem>>, vector<1x8x32xf32>
    %98 = vector.shape_cast %97 : vector<1x8x32xf32> to vector<8x32xf32>
    %cst_47 = arith.constant dense<0.000000e+00> : vector<8x256xf32>
    %99 = tpu.matmul %98, %96, %cst_47 {dimension_numbers = #tpu.dot_dimension_numbers<[1], [0], [0], [1], [0, 0, 1, 1], [], []>} : vector<8x32xf32>, vector<32x256xf32>, vector<8x256xf32> -> vector<8x256xf32>
    %100 = arith.addf %95, %99 : vector<8x256xf32>
    %101 = vector.extract_strided_slice %18 {offsets = [0, 34], sizes = [32, 256], strides = [1, 1]} : vector<32x290xf32> to vector<32x256xf32>
    %cst_48 = arith.constant 0.000000e+00 : f32
    %102 = vector.shape_cast %39 : vector<1x256xi1> to vector<1x256xi1>
    %103 = vector.broadcast %102 : vector<1x256xi1> to vector<32x256xi1>
    %104 = vector.broadcast %cst_48 : f32 to vector<32x256xf32>
    %105 = arith.select %103, %101, %104 : vector<32x256xi1>, vector<32x256xf32>
    %c8 = arith.constant 8 : index
    %c0_49 = arith.constant 0 : index
    %c0_50 = arith.constant 0 : index
    %106 = vector.load %arg6[%c8, %c0_49, %c0_50] : memref<9x8x32xf32, #tpu.memory_space<vmem>>, vector<1x8x32xf32>
    %107 = vector.shape_cast %106 : vector<1x8x32xf32> to vector<8x32xf32>
    %cst_51 = arith.constant dense<0.000000e+00> : vector<8x256xf32>
    %108 = tpu.matmul %107, %105, %cst_51 {dimension_numbers = #tpu.dot_dimension_numbers<[1], [0], [0], [1], [0, 0, 1, 1], [], []>} : vector<8x32xf32>, vector<32x256xf32>, vector<8x256xf32> -> vector<8x256xf32>
    %109 = arith.addf %100, %108 : vector<8x256xf32>
    %110 = tpu.concatenate %1, %109 in 0 : vector<4x256xf32>, vector<8x256xf32> -> vector<12x256xf32>
    %111 = vector.shape_cast %110 : vector<12x256xf32> to vector<1x12x256xf32>
    %c0_52 = arith.constant 0 : index
    %c0_53 = arith.constant 0 : index
    %c0_54 = arith.constant 0 : index
    %112 = vector.load %arg7[%c0_52, %c0_53, %c0_54] : memref<1x12x256xf32, #tpu.memory_space<vmem>>, vector<1x12x256xf32>
    tpu.vector_store %arg7[%c0_52, %c0_53, %c0_54], %111 {strides = array<i32>} : memref<1x12x256xf32, #tpu.memory_space<vmem>>, vector<1x12x256xf32>,
    return
  }
  func.func @transform_0(%arg0: i32) -> (i32, i32, i32) {
    %c0_i32 = arith.constant 0 : i32
    %c0_i32_0 = arith.constant 0 : i32
    %c0_i32_1 = arith.constant 0 : i32
    return %arg0, %c0_i32, %c0_i32_0 : i32, i32, i32
  }
  func.func @transform_1(%arg0: i32) -> (i32, i32) {
    %c0_i32 = arith.constant 0 : i32
    %c0_i32_0 = arith.constant 0 : i32
    %c0_i32_1 = arith.constant 0 : i32
    return %c0_i32, %c0_i32_0 : i32, i32
  }
  func.func @transform_2(%arg0: i32) -> (i32, i32) {
    %c0_i32 = arith.constant 0 : i32
    %c0_i32_0 = arith.constant 0 : i32
    %c0_i32_1 = arith.constant 0 : i32
    return %c0_i32, %c0_i32_0 : i32, i32
  }
  func.func @transform_3(%arg0: i32) -> (i32, i32) {
    %c0_i32 = arith.constant 0 : i32
    %c0_i32_0 = arith.constant 0 : i32
    %c0_i32_1 = arith.constant 0 : i32
    return %c0_i32, %c0_i32_0 : i32, i32
  }
  func.func @transform_4(%arg0: i32) -> (i32, i32) {
    %c0_i32 = arith.constant 0 : i32
    %c0_i32_0 = arith.constant 0 : i32
    %c0_i32_1 = arith.constant 0 : i32
    return %c0_i32, %c0_i32_0 : i32, i32
  }
  func.func @transform_5(%arg0: i32) -> (i32, i32, i32) {
    %c0_i32 = arith.constant 0 : i32
    %c0_i32_0 = arith.constant 0 : i32
    %c0_i32_1 = arith.constant 0 : i32
    %c0_i32_2 = arith.constant 0 : i32
    return %c0_i32, %c0_i32_0, %c0_i32_1 : i32, i32, i32
  }
  func.func @transform_6(%arg0: i32) -> (i32, i32, i32) {
    %c0_i32 = arith.constant 0 : i32
    %c0_i32_0 = arith.constant 0 : i32
    %c0_i32_1 = arith.constant 0 : i32
    return %arg0, %c0_i32, %c0_i32_0 : i32, i32, i32
  }
}

</mosaic_0001>

<bundles_post_ra>
// kernel: tpu_custom_call.1
= control target key start
LH: loop header
LB: loop body
LE: loop exit
PB: predicated region body
PF: predicated region fallthrough
CT: control target
= control target key end

     0   :  { %s2202_s21 = smov 0   ;;  %s2746_s0 = inlined_call_operand.vmem [shape: f32[2,4,256], index: 0, kind: input, shape index: {}]   ;;  %s2747_s1 = inlined_call_operand.vmem [shape: f32[4,1], index: 1, kind: input, shape index: {}]   ;;  %s2748_s2 = inlined_call_operand.vmem [shape: f32[4,1], index: 2, kind: input, shape index: {}]   ;;  %s2749_s3 = inlined_call_operand.vmem [shape: f32[32,4], index: 3, kind: input, shape index: {}]   ;;  %s2750_s4 = inlined_call_operand.vmem [shape: f32[32,1], index: 4, kind: input, shape index: {}]   ;;  %s2751_s5 = inlined_call_operand.vmem [shape: f32[9,8,32], index: 5, kind: input, shape index: {}]   ;;  %s2752_s6 = inlined_call_operand.vmem [shape: f32[2,12,256], index: 6, kind: output, shape index: {}]  }
   0x1 LB: > { %s1667_s22 = sadd.s32 4294967295, %s2153_s21   ;;  %p1671_p0 = scmp.ge.s32.totalorder %s2153_s21, 1  ;;  %s2153_s21 = sphi %s2202_s21, %s16_s21  }
   0x2   : > { %p212_p1 = scmp.lt.s32.totalorder %s2153_s21, 3 }
   0x4   : > { %p213_p2 = pnand %p1671_p0, %p212_p1 }
   0x5   : > { %v253_v0 = vld [vmem:[%s2747_s1] sm:$0xf] (!%p213_p2)  ;;  %v2155_v1 = vmov (!%p213_p2), 0   ;;  %v288_v3 = vld [vmem:[%s2750_s4 + $0x10] sm:$0xff] (!%p213_p2)  ;;  %v2156_v4 = vmov (!%p213_p2), 0.0   ;;  %v287_v6 = vld [vmem:[%s2750_s4 + $0x8] sm:$0xff] (!%p213_p2)  ;;  %v261_v10 = vlaneseq (!%p213_p2) }
   0x6   : > { %216 = sbr.rel (%p213_p2) target bundleno = 926 (0x39e), region = 44  ;;  %1883 = vset.pattern.permute.xlu0 (!%p213_p2), %v2155_v1  ;;  %1884 = vset.pattern.permute.xlu1 (!%p213_p2), %v2155_v1  ;;  %v267_v2 = vld [vmem:[%s2748_s2] sm:$0xf] (!%p213_p2)  ;;  %v289_v7 = vld [vmem:[%s2750_s4 + $0x18] sm:$0xff] (!%p213_p2)  ;;  %p242_p3 = scmp.lt.s32.totalorder (!%p213_p2), %s1667_s22, 1  ;;  %vm325_vm0 = vcmask (!%p213_p2), 1043456  }
   0x7   : > { %256 = vperm.xlu0 (!%p213_p2), %1883, %v253_v0   ;;  %394 = vmatprep.mubr.f32.mxu0 (!%p213_p2), %v2156_v4  ;;  %v286_v5 = vld [vmem:[%s2750_s4] sm:$0xff] (!%p213_p2)  ;;  %v2157_v8 = vmov (!%p213_p2), 839922192   ;;  %v262_v12 = vshrl.u32 (!%p213_p2), %v261_v10, 7  ;;  %vm312_vm1 = vcmask (!%p213_p2), 31744   ;;  %v283_v24 = vld [vmem:[%s2749_s3 + $0x8] sm:$0xff] (!%p213_p2) }
   0x8   : > { %1088 = vmatprep.mubr.f32.mxu1 (!%p213_p2), %v2156_v4  ;;  %292 = vperm.xlu1 (!%p213_p2), %1884, %v286_v5   ;;  %v259_v9 = vunpack.c.l.s4 (!%p213_p2), %v2157_v8  ;;  %v282_v23 = vld [vmem:[%s2749_s3] sm:$0xff] (!%p213_p2)  ;;  %v284_v25 = vld [vmem:[%s2749_s3 + $0x10] sm:$0xff] (!%p213_p2)  ;;  %v285_v26 = vld [vmem:[%s2749_s3 + $0x18] sm:$0xff] (!%p213_p2)  ;;  %s2158_s25 = smov (!%p213_p2), 17   ;;  %vm451_vm2 = vcmask (!%p213_p2), 138240   ;;  %s2159_s26 = smov (!%p213_p2), 111  }
   0x9   : > { %s2160_s27 = smov (!%p213_p2), 110   ;;  %s2161_s28 = smov (!%p213_p2), 127   ;;  %vm1004_vm3 = vcmask (!%p213_p2), 908288   ;;  %vm554_vm4 = vcmask (!%p213_p2), 1039360   ;;  %vm1121_vm5 = vcmask (!%p213_p2), 900096   ;;  %vm1248_vm6 = vcmask (!%p213_p2), 785408  }
   0xa   : > { %v260_v11 = vunpack.c.0.s8 (!%p213_p2), %v259_v9  ;;  %s2162_s29 = smov (!%p213_p2), 95   ;;  %s2163_s30 = smov (!%p213_p2), 96   ;;  %vm748_vm7 = vcmask (!%p213_p2), 1031168   ;;  %vm1377_vm8 = vcmask (!%p213_p2), 777216   ;;  %vm571_vm11 = vcmask (!%p213_p2), 261120  }
   0xb   : > { %270 = vperm.xlu0 (!%p213_p2), %1883, %v267_v2   ;;  %s2164_s7 = smov (!%p213_p2), 126   ;;  %s2165_s8 = smov (!%p213_p2), 112  }
   0xc   : > { %297 = vperm.xlu1 (!%p213_p2), %1884, %v287_v6   ;;  %v263_v13 = vsub.s32 (!%p213_p2), %v260_v11, %v262_v12  ;;  %s2166_s9 = smov (!%p213_p2), 94  }
   0xd   : > { %s2772_s22 = smov (!%p242_p3, %s1667_s22), 1 }
   0xe   : > { %s1749_s11 = sshll.u32 %s2772_s22, 3 }
   0xf   : > { %302 = vperm.xlu0 %1883, %v288_v3   ;;  %s2237_s14 = scalar_lea.vmem %s2746_s0, %s1749_s11 }
  0x10   : > { %307 = vperm.xlu1 %1884, %v289_v7   ;;  %v252_v16 = vld [vmem:[%s2237_s14] sm:$0xff] }
  0x86   : > { %v257_v14 = vpop.permute.xlu0 %256 }
  0x87   : > { %v264_v15 = vrot.slane %v257_v14, %v263_v13  ;;  %v293_v27 = vpop.permute.xlu1 %292 }
  0x89   : > { %v266_v18 = vmul.f32 %v264_v15, %v252_v16 }
  0x8a   : > { %v271_v17 = vpop.permute.xlu0 %270 }
  0x8b   : > { %v278_v19 = vrot.slane %v271_v17, %v263_v13  ;;  %v298_v33 = vpop.permute.xlu1 %297 }
  0x8d   : > { %v280_v20 = vadd.f32 %v278_v19, %v266_v18 }
  0x8e   : > { %v303_v41 = vpop.permute.xlu0 %302 }
  0x8f   : > { %v281_v21 = vmax.f32 %v280_v20, 0.0  ;;  %v308_v49 = vpop.permute.xlu1 %307 }
  0x91   : > { %v311_v22 = vcombine.high %v281_v21, %v281_v21 }
  0x93   : > { %1676 = vmatprep.subr.msk.mxu0 %vm325_vm0, %v311_v22 }
  0x94   : > { %1677 = vmatpush1.msk.msra.mxu0 %vm325_vm0, %v281_v21 }
  0x95   : > { %1678 = vmatmul.mubr.msk.f32.vlgmr.msra.gmra.mrb[0].mxu0 %vm312_vm1, %v282_v23 }
  0x96   : > { %400 = vmatprep.mubr.f32.mxu0 %v2156_v4 }
  0x99   : > { %1679 = vmatmul.mubr.msk.f32.gmra.mrb[2].mxu0 %vm312_vm1, %v283_v24 }
  0x9a   : > { %406 = vmatprep.mubr.f32.mxu0 %v2156_v4 }
  0x9d   : > { %1680 = vmatmul.mubr.msk.f32.gmra.mrb[4].mxu0 %vm312_vm1, %v284_v25 }
  0x9e   : > { %412 = vmatprep.mubr.f32.mxu0 %v2156_v4 }
  0xa1   : > { %1681 = vmatmul.mubr.msk.f32.gmra.mrb[6].mxu0 %vm312_vm1, %v285_v26 }
  0xa2   : > { %639 = vmatprep.mubr.f32.mxu0 %v2156_v4 }
 0x168   : > { %v396_v28 = vpop.f32.mrb[0].mxu0 }
 0x169   : > { %v397_v29 = vadd.f32 %v396_v28, %v293_v27  ;;  %v398_v30 = vpop.f32.mrb[1].mxu0 }
 0x16a   : > { %v399_v31 = vadd.f32 %v398_v30, %v293_v27 }
 0x16b   : > { %v419_v32 = vmax.f32 %v397_v29, 0.0 }
 0x16c   : > { %v420_v34 = vmax.f32 %v399_v31, 0.0  ;;  %v402_v35 = vpop.f32.mrb[2].mxu0 }
 0x16d   : > { %v403_v36 = vadd.f32 %v402_v35, %v298_v33  ;;  %v404_v37 = vpop.f32.mrb[3].mxu0 }
 0x16e   : > { %v1885_v38 = vpack.i.bf16 %v420_v34, %v419_v32  ;;  %v405_v39 = vadd.f32 %v404_v37, %v298_v33 }
 0x16f   : > { %v421_v40 = vmax.f32 %v403_v36, 0.0 }
 0x170   : > { %v422_v42 = vmax.f32 %v405_v39, 0.0  ;;  %v408_v43 = vpop.f32.mrb[4].mxu0  ;;  %1886 = vrot.lane.b32.xlu0 %v1885_v38, %s2158_s25 }
 0x171   : > { %v409_v44 = vadd.f32 %v408_v43, %v303_v41  ;;  %v410_v45 = vpop.f32.mrb[5].mxu0 }
 0x172   : > { %v1890_v46 = vpack.i.bf16 %v422_v42, %v421_v40  ;;  %v411_v47 = vadd.f32 %v410_v45, %v303_v41 }
 0x173   : > { %v423_v48 = vmax.f32 %v409_v44, 0.0 }
 0x174   : > { %v424_v50 = vmax.f32 %v411_v47, 0.0  ;;  %v414_v51 = vpop.f32.mrb[6].mxu0  ;;  %1891 = vrot.lane.b32.xlu1 %v1890_v46, %s2158_s25 }
 0x175   : > { %v415_v52 = vadd.f32 %v414_v51, %v308_v49  ;;  %v416_v53 = vpop.f32.mrb[7].mxu0 }
 0x176   : > { %v1895_v54 = vpack.i.bf16 %v424_v50, %v423_v48  ;;  %v417_v55 = vadd.f32 %v416_v53, %v308_v49 }
 0x177   : > { %v425_v56 = vmax.f32 %v415_v52, 0.0 }
 0x178   : > { %v426_v57 = vmax.f32 %v417_v55, 0.0  ;;  %1896 = vrot.lane.b32.xlu0 %v1895_v54, %s2158_s25 }
 0x17a   : > { %v1900_v58 = vpack.i.bf16 %v426_v57, %v425_v56 }
 0x17c   : > { %1901 = vrot.lane.b32.xlu1 %v1900_v58, %s2158_s25 }
 0x1e2   : > { %v1887_v59 = vpop.permute.xlu0 %1886 }
 0x1e3   : > { %v1889_v60 = vunpack.i.h.bf16 %v1887_v59  ;;  %v1888_v61 = vunpack.i.l.bf16 %v1887_v59 }
 0x1e5   : > { %v472_v62 = vsel %vm451_vm2, %v1889_v60, 0.0  ;;  %v2260_v63 = vsel %vm451_vm2, %v1888_v61, %v1889_v60  ;;  %v2268_v3 = vsel %vm451_vm2, 0.0, %v1888_v61 }
 0x1e6   : > { %v1892_v0 = vpop.permute.xlu1 %1891  ;;  %v2263_v1 = vpack.i.bf16 %v472_v62, %v2260_v63 }
 0x1e7   : > { %v1893_v2 = vunpack.i.l.bf16 %v1892_v0  ;;  %v1894_v7 = vunpack.i.h.bf16 %v1892_v0 }
 0x1e8   : > { %1906 = vrot.lane.b32.xlu0 %v2263_v1, %s2159_s26 }
 0x1e9   : > { %v2271_v5 = vsel %vm451_vm2, 0.0, %v1893_v2  ;;  %v473_v9 = vsel %vm451_vm2, %v1894_v7, 0.0  ;;  %v2283_v11 = vsel %vm451_vm2, %v1893_v2, %v1894_v7 }
 0x1ea   : > { %v2275_v6 = vpack.i.bf16 %v2271_v5, %v2268_v3  ;;  %v1897_v12 = vpop.permute.xlu0 %1896  ;;  %v1965_v17 = vpack.i.bf16 %v473_v9, %v2283_v11  ;;  %v1759_v22 = vpack.c.bf16 %v2283_v11, %v2260_v63  ;;  %v1762_v23 = vpack.c.bf16 %v2271_v5, %v2268_v3 }
 0x1eb   : > { %v1899_v15 = vunpack.i.h.bf16 %v1897_v12  ;;  %v1898_v16 = vunpack.i.l.bf16 %v1897_v12 }
 0x1ec   : > { %1946 = vrot.lane.b32.xlu1 %v2275_v6, %s2160_s27  ;;  %1911 = vrot.lane.b32.xlu0 %v2263_v1, %s2161_s28 }
 0x1ed   : > { %v2300_v20 = vsel %vm451_vm2, %v1898_v16, %v1899_v15  ;;  %v2303_v21 = vsel %vm451_vm2, 0.0, %v1898_v16  ;;  %v474_v26 = vsel %vm451_vm2, %v1899_v15, 0.0 }
 0x1ee   : > { %v1902_v8 = vpop.permute.xlu1 %1901  ;;  %v1995_v27 = vpack.i.bf16 %v474_v26, %v2300_v20  ;;  %v477_v26 = vand.u32 127, %v261_v10 }
 0x1ef   : > { %v1904_v13 = vunpack.i.h.bf16 %v1902_v8  ;;  %v1903_v14 = vunpack.i.l.bf16 %v1902_v8 }
 0x1f0   : > { %1961 = vrot.lane.b32.xlu1 %v2275_v6, %s2162_s29  ;;  %1916 = vrot.lane.b32.xlu0 %v2263_v1, %s2160_s27 }
 0x1f1   : > { %v2291_v18 = vsel %vm451_vm2, %v1903_v14, %v1904_v13  ;;  %v2297_v19 = vsel %vm451_vm2, 0.0, %v1903_v14  ;;  %v475_v29 = vsel %vm451_vm2, %v1904_v13, 0.0 }
 0x1f2   : > { %v2020_v28 = vpack.i.bf16 %v2297_v19, %v2303_v21  ;;  %v2040_v30 = vpack.i.bf16 %v475_v29, %v2291_v18  ;;  %v478_v29 = vadd.s32 128, %v477_v26  ;;  %v2769_v5 = vpack.c.bf16 %v2291_v18, %v2300_v20 }
 0x1f4   : > { %1966 = vrot.lane.b32.xlu1 %v1965_v17, %s2159_s26  ;;  %1921 = vrot.lane.b32.xlu0 %v2263_v1, %s2163_s30 }
 0x1f8   : > { %1971 = vrot.lane.b32.xlu1 %v1965_v17, %s2161_s28  ;;  %1926 = vrot.lane.b32.xlu0 %v2263_v1, %s2164_s7 }
 0x1fc   : > { %1976 = vrot.lane.b32.xlu1 %v1965_v17, %s2160_s27  ;;  %1931 = vrot.lane.b32.xlu0 %v2263_v1, %s2162_s29 }
 0x200   : > { %1981 = vrot.lane.b32.xlu1 %v1965_v17, %s2163_s30  ;;  %1936 = vrot.lane.b32.xlu0 %v2275_v6, %s2159_s26 }
 0x204   : > { %1986 = vrot.lane.b32.xlu1 %v1965_v17, %s2164_s7  ;;  %1941 = vrot.lane.b32.xlu0 %v2275_v6, %s2161_s28 }
 0x208   : > { %1991 = vrot.lane.b32.xlu1 %v1965_v17, %s2162_s29  ;;  %1951 = vrot.lane.b32.xlu0 %v2275_v6, %s2163_s30 }
 0x20c   : > { %1996 = vrot.lane.b32.xlu1 %v1995_v27, %s2159_s26  ;;  %1956 = vrot.lane.b32.xlu0 %v2275_v6, %s2164_s7 }
 0x210   : > { %2011 = vrot.lane.b32.xlu1 %v1995_v27, %s2163_s30  ;;  %2001 = vrot.lane.b32.xlu0 %v1995_v27, %s2161_s28 }
 0x214   : > { %2021 = vrot.lane.b32.xlu1 %v2020_v28, %s2159_s26  ;;  %2006 = vrot.lane.b32.xlu0 %v1995_v27, %s2160_s27 }
 0x218   : > { %2031 = vrot.lane.b32.xlu1 %v2020_v28, %s2160_s27  ;;  %2016 = vrot.lane.b32.xlu0 %v1995_v27, %s2164_s7 }
 0x21c   : > { %2036 = vrot.lane.b32.xlu1 %v2020_v28, %s2163_s30  ;;  %2026 = vrot.lane.b32.xlu0 %v2020_v28, %s2161_s28 }
 0x220   : > { %2056 = vrot.lane.b32.xlu1 %v2020_v28, %s2162_s29  ;;  %2041 = vrot.lane.b32.xlu0 %v2040_v30, %s2159_s26 }
 0x224   : > { %2066 = vrot.lane.b32.xlu1 %v1965_v17, %s2165_s8  ;;  %2046 = vrot.lane.b32.xlu0 %v1995_v27, %s2162_s29 }
 0x228   : > { %2071 = vrot.lane.b32.xlu1 %v2040_v30, %s2161_s28  ;;  %2051 = vrot.lane.b32.xlu0 %v2020_v28, %s2164_s7 }
 0x22c   : > { %2076 = vrot.lane.b32.xlu1 %v2040_v30, %s2160_s27  ;;  %2061 = vrot.lane.b32.xlu0 %v2263_v1, %s2165_s8 }
 0x230   : > { %2091 = vrot.lane.b32.xlu1 %v1965_v17, %s2166_s9  ;;  %2081 = vrot.lane.b32.xlu0 %v2040_v30, %s2163_s30 }
 0x234   : > { %2101 = vrot.lane.b32.xlu1 %v2275_v6, %s2166_s9  ;;  %2086 = vrot.lane.b32.xlu0 %v2263_v1, %s2166_s9 }
 0x238   : > { %2116 = vrot.lane.b32.xlu1 %v2040_v30, %s2164_s7  ;;  %2096 = vrot.lane.b32.xlu0 %v2275_v6, %s2165_s8  ;;  %s1750_s7 = sshll.u32 %s2772_s22, 5 }
 0x239   : > { %s251_s10 = scalar_lea.vmem %s2752_s6, %s1750_s7 }
 0x23c   : > { %2121 = vrot.lane.b32.xlu1 %v2040_v30, %s2162_s29  ;;  %2106 = vrot.lane.b32.xlu0 %v1995_v27, %s2165_s8 }
 0x240   : > { %2126 = vrot.lane.b32.xlu1 %v2040_v30, %s2165_s8  ;;  %2111 = vrot.lane.b32.xlu0 %v1995_v27, %s2166_s9 }
 0x244   : > { %2131 = vrot.lane.b32.xlu1 %v2040_v30, %s2166_s9  ;;  %2136 = vrot.lane.b32.xlu0 %v2020_v28, %s2165_s8 }
 0x248   : > { %2141 = vrot.lane.b32.xlu1 %v2020_v28, %s2166_s9 }
 0x25a   : > { %v1907_v31 = vpop.permute.xlu0 %1906 }
 0x25b   : > { %v1909_v36 = vunpack.i.h.bf16 %v1907_v31  ;;  %v1908_v37 = vunpack.i.l.bf16 %v1907_v31 }
 0x25d   : > { %v1006_v44 = vsel %vm1004_vm3, %v1908_v37, %v1909_v36  ;;  %v490_v36 = vand.u32 15, %v478_v29 }
 0x25e   : > { %v2358_v32 = vpop.permute.xlu1 %1946  ;;  %v1912_v33 = vpop.permute.xlu0 %1911 }
 0x25f   : > { %v1914_v42 = vunpack.i.h.bf16 %v1912_v33  ;;  %v1913_v43 = vunpack.i.l.bf16 %v1912_v33  ;;  %v483_v33 = vand.u32 15, %v477_v26  ;;  %v1949_v10 = vunpack.i.h.bf16 %v2358_v32 }
 0x260   : > { %vm2408_vm9 = vcmp.le.s32.totalorder %v490_v36, 14  ;;  %vm2432_vm12 = vcmp.ge.s32.totalorder %v490_v36, 1 }
 0x261   : > { %v556_v51 = vsel %vm554_vm4, %v1913_v43, %v1914_v42  ;;  %vm2412_vm10 = vcmp.le.s32.totalorder %v483_v33, 14  ;;  %vm2457_vm13 = vmpackc.low %vm2408_vm9, %vm2408_vm9  ;;  %vm2461_vm14 = vcmp.ge.s32.totalorder %v483_v33, 1 }
 0x262   : > { %v2360_v34 = vpop.permute.xlu1 %1961  ;;  %v2362_v35 = vpop.permute.xlu0 %1916  ;;  %vm2502_vm15 = vmpackc.low %vm2412_vm10, %vm2412_vm10 }
 0x263   : > { %vm2534_vm1 = vmpackc.low %vm2432_vm12, %vm2432_vm12 }
 0x264   : > { %vm2565_vm2 = vmpackc.low %vm2461_vm14, %vm2461_vm14 }
 0x266   : > { %v1967_v38 = vpop.permute.xlu1 %1966  ;;  %v2364_v39 = vpop.permute.xlu0 %1921 }
 0x267   : > { %v1969_v40 = vunpack.i.h.bf16 %v1967_v38  ;;  %v1968_v41 = vunpack.i.l.bf16 %v1967_v38 }
 0x269   : > { %v1008_v45 = vsel %vm1004_vm3, %v1968_v41, %v1969_v40  ;;  %v1948_v40 = vunpack.i.l.bf16 %v2358_v32  ;;  %v1918_v32 = vunpack.i.l.bf16 %v2362_v35 }
 0x26a   : > { %v1972_v46 = vpop.permute.xlu1 %1971  ;;  %v2368_v47 = vpop.permute.xlu0 %1926  ;;  %v1795_v48 = vpack.c.bf16 %v1008_v45, %v1006_v44  ;;  %v1963_v44 = vunpack.i.l.bf16 %v2360_v34  ;;  %v1919_v45 = vunpack.i.h.bf16 %v2362_v35 }
 0x26b   : > { %v1974_v49 = vunpack.i.h.bf16 %v1972_v46  ;;  %v1973_v50 = vunpack.i.l.bf16 %v1972_v46  ;;  %v1122_v24 = vsel %vm1121_vm5, %v1948_v40, %v1918_v32 }
 0x26c   : > { %1796 = vmatprep.subr.bf16.mxu1 %v1795_v48 }
 0x26d   : > { %v558_v52 = vsel %vm554_vm4, %v1973_v50, %v1974_v49 }
 0x26e   : > { %v2372_v53 = vpop.permute.xlu1 %1976  ;;  %v2374_v54 = vpop.permute.xlu0 %1931  ;;  %v1751_v55 = vpack.c.bf16 %v558_v52, %v556_v51  ;;  %v1924_v52 = vunpack.i.h.bf16 %v2364_v39 }
 0x26f   : > { %v1979_v46 = vunpack.i.h.bf16 %v2372_v53  ;;  %v1978_v48 = vunpack.i.l.bf16 %v2372_v53 }
 0x270   : > { %1752 = vmatprep.subr.bf16.mxu0 %v1751_v55  ;;  %v1923_v55 = vunpack.i.l.bf16 %v2364_v39  ;;  %v1682_v39 = vld [vmem:[%s2751_s5 + $0x8] sm:$0xff] }
 0x272   : > { %v2376_v56 = vpop.permute.xlu1 %1981  ;;  %v1937_v57 = vpop.permute.xlu0 %1936 }
 0x273   : > { %v1939_v58 = vunpack.i.h.bf16 %v1937_v57  ;;  %v1938_v59 = vunpack.i.l.bf16 %v1937_v57  ;;  %v1929_v57 = vunpack.i.h.bf16 %v2368_v47 }
 0x275   : > { %v1005_v60 = vsel %vm1004_vm3, %v1938_v59, %v1908_v37  ;;  %v1007_v61 = vsel %vm1004_vm3, %v1939_v58, %v1968_v41  ;;  %v1964_v41 = vunpack.i.h.bf16 %v2360_v34  ;;  %v1984_v58 = vunpack.i.h.bf16 %v2376_v56 }
 0x276   : > { %v2380_v62 = vpop.permute.xlu1 %1986  ;;  %v1942_v0 = vpop.permute.xlu0 %1941  ;;  %v1797_v1 = vpack.c.bf16 %v1007_v61, %v1005_v60  ;;  %v1983_v61 = vunpack.i.l.bf16 %v2376_v56 }
 0x277   : > { %v1944_v2 = vunpack.i.h.bf16 %v1942_v0  ;;  %v1943_v6 = vunpack.i.l.bf16 %v1942_v0  ;;  %v1989_v29 = vunpack.i.h.bf16 %v2380_v62 }
 0x278   : > { %1798 = vmatpush1.bf16.msra.mxu1 %v1797_v1  ;;  %v1928_v1 = vunpack.i.l.bf16 %v2368_v47  ;;  %v1715_v47 = vld [vmem:[%s2751_s5 + $0x28] sm:$0xff] }
 0x279   : > { %v557_v7 = vsel %vm554_vm4, %v1944_v2, %v1973_v50  ;;  %v555_v8 = vsel %vm554_vm4, %v1943_v6, %v1913_v43  ;;  %v1125_v2 = vsel %vm1121_vm5, %v1978_v48, %v1979_v46  ;;  %v1934_v6 = vunpack.i.h.bf16 %v2374_v54 }
 0x27a   : > { %v1753_v9 = vpack.c.bf16 %v557_v7, %v555_v8  ;;  %v2384_v12 = vpop.permute.xlu1 %1991  ;;  %v2386_v13 = vpop.permute.xlu0 %1951  ;;  %v1933_v7 = vunpack.i.l.bf16 %v2374_v54  ;;  %v1988_v46 = vunpack.i.l.bf16 %v2380_v62  ;;  %v2475_v42 = vsel %vm748_vm7, %v1928_v1, %v1929_v57 }
 0x27c   : > { %1754 = vmatpush1.bf16.msra.mxu0 %v1753_v9  ;;  %v2478_v33 = vsel %vm1377_vm8, %v1963_v44, %v1933_v7  ;;  %v2492_v57 = vsel %vm748_vm7, %v1988_v46, %v1989_v29  ;;  %v1993_v44 = vunpack.i.l.bf16 %v2384_v12 }
 0x27e   : > { %v1997_v14 = vpop.permute.xlu1 %1996  ;;  %v2388_v15 = vpop.permute.xlu0 %1956 }
 0x27f   : > { %v1999_v49 = vunpack.i.h.bf16 %v1997_v14  ;;  %v1998_v50 = vunpack.i.l.bf16 %v1997_v14 }
 0x281   : > { %v1010_v9 = vsel %vm1004_vm3, %v1998_v50, %v1999_v49  ;;  %v1123_v49 = vsel %vm1121_vm5, %v1918_v32, %v1919_v45 }
 0x282   : > { %v2390_v16 = vpop.permute.xlu1 %2011  ;;  %v2392_v17 = vpop.permute.xlu0 %2001  ;;  %v1803_v40 = vpack.c.bf16 %v1125_v2, %v1123_v49 }
 0x283   : > { %v2004_v45 = vunpack.i.h.bf16 %v2392_v17 }
 0x286   : > { %v2022_v27 = vpop.permute.xlu1 %2021  ;;  %v2395_v28 = vpop.permute.xlu0 %2006 }
 0x287   : > { %v2023_v51 = vunpack.i.l.bf16 %v2022_v27  ;;  %v2024_v53 = vunpack.i.h.bf16 %v2022_v27  ;;  %v2009_v29 = vunpack.i.h.bf16 %v2395_v28 }
 0x289   : > { %v1009_v26 = vsel %vm1004_vm3, %v2023_v51, %v1998_v50  ;;  %v2452_v50 = vsel %vm1248_vm6, %v1983_v61, %v1984_v58  ;;  %v2485_v58 = vsel %vm1377_vm8, %v1933_v7, %v1934_v6  ;;  %v1954_v6 = vunpack.i.h.bf16 %v2386_v13 }
 0x28a   : > { %v2397_v30 = vpop.permute.xlu1 %2031  ;;  %v2399_v31 = vpop.permute.xlu0 %2016 }
 0x28e   : > { %v2401_v37 = vpop.permute.xlu1 %2036  ;;  %v2403_v38 = vpop.permute.xlu0 %2026 }
 0x28f   : > { %v2028_v32 = vunpack.i.l.bf16 %v2403_v38  ;;  %v2029_v7 = vunpack.i.h.bf16 %v2403_v38 }
 0x292   : > { %v2425_v59 = vpop.permute.xlu1 %2056  ;;  %v2042_v60 = vpop.permute.xlu0 %2041 }
 0x293   : > { %v2044_v0 = vunpack.i.h.bf16 %v2042_v60  ;;  %v2043_v35 = vunpack.i.l.bf16 %v2042_v60 }
 0x295   : > { %v1012_v14 = vsel %vm1004_vm3, %v2043_v35, %v2044_v0  ;;  %v1011_v27 = vsel %vm1004_vm3, %v2024_v53, %v2043_v35  ;;  %v1124_v0 = vsel %vm1121_vm5, %v1949_v10, %v1978_v48  ;;  %v2468_v10 = vsel %vm1248_vm6, %v1923_v55, %v1924_v52  ;;  %v1713_v52 = vld [vmem:[%s2751_s5 + $0x20] sm:$0xff] }
 0x296   : > { %v2442_v60 = vpop.permute.xlu1 %2066  ;;  %v2444_v25 = vpop.permute.xlu0 %2046  ;;  %v1799_v54 = vpack.c.bf16 %v1012_v14, %v1010_v9  ;;  %v1801_v36 = vpack.c.bf16 %v1011_v27, %v1009_v26  ;;  %v2003_v48 = vunpack.i.l.bf16 %v2392_v17  ;;  %v1806_v17 = vpack.c.bf16 %v1124_v0, %v1122_v24 }
 0x297   : > { %v1815_v35 = vpack.c.bf16 %v2452_v50, %v2468_v10  ;;  %v1953_v27 = vunpack.i.l.bf16 %v2386_v13  ;;  %v1771_v13 = vpack.c.bf16 %v2492_v57, %v2475_v42  ;;  %vm875_vm3 = vcmask 916480  }
 0x298   : > { %1800 = vmatprep.subr.bf16.mxu1 %v1799_v54  ;;  %v2008_v54 = vunpack.i.l.bf16 %v2395_v28  ;;  %v560_v43 = vsel %vm554_vm4, %v2003_v48, %v2004_v45  ;;  %v559_v49 = vsel %vm554_vm4, %v2028_v32, %v2003_v48  ;;  %v1994_v28 = vunpack.i.h.bf16 %v2384_v12 }
 0x299   : > { %1802 = vmatpush1.bf16.msra.mxu1 %v1801_v36  ;;  %v2033_v36 = vunpack.i.l.bf16 %v2397_v30  ;;  %v2528_v48 = vsel %vm1377_vm8, %v1964_v41, %v1993_v44  ;;  %v2034_v32 = vunpack.i.h.bf16 %v2397_v30  ;;  %v1251_v12 = vsel %vm1248_vm6, %v1954_v6, %v1983_v61 }
 0x29a   : > { %v2072_v2 = vpop.permute.xlu1 %2071  ;;  %v2495_v9 = vpop.permute.xlu0 %2051  ;;  %1805 = vmatprep.subr.msk.bf16.mxu1 %vm2457_vm13, %v1803_v40  ;;  %v1249_v34 = vsel %vm1248_vm6, %v1953_v27, %v1923_v55  ;;  %v1959_v41 = vunpack.i.h.bf16 %v2388_v15  ;;  %v1958_v30 = vunpack.i.l.bf16 %v2388_v15  ;;  %v1127_v8 = vsel %vm1121_vm5, %v2008_v54, %v2009_v29 }
 0x29b   : > { %v2074_v14 = vunpack.i.h.bf16 %v2072_v2  ;;  %v2073_v26 = vunpack.i.l.bf16 %v2072_v2  ;;  %v1829_v56 = vpack.c.bf16 %v2528_v48, %v2478_v33  ;;  %v2570_v29 = vsel %vm1377_vm8, %v1993_v44, %v1994_v28 }
 0x29c   : > { %1714 = vmatmul.mubr.msk.f32.vlgmr.msra.gmra.mrb[0].mxu1 %vm571_vm11, %v1713_v52  ;;  %v1818_v63 = vpack.c.bf16 %v1251_v12, %v1249_v34  ;;  %v751_v11 = vsel %vm748_vm7, %v1959_v41, %v1988_v46  ;;  %v2019_v53 = vunpack.i.h.bf16 %v2399_v31  ;;  %v2038_v44 = vunpack.i.l.bf16 %v2401_v37 }
 0x29d   : > { %v561_v0 = vsel %vm554_vm4, %v2029_v7, %v2073_v26  ;;  %1808 = vmatpush1.bf16.msk.msra.mxu1 %vm2502_vm15, %v1806_v17  ;;  %v562_v38 = vsel %vm554_vm4, %v2073_v26, %v2074_v14  ;;  %1215 = vmatprep.mubr.f32.mxu1 %v2156_v4  ;;  %v1126_v26 = vsel %vm1121_vm5, %v2033_v36, %v2008_v54  ;;  %v2014_v54 = vunpack.i.h.bf16 %v2390_v16 }
 0x29e   : > { %v1757_v40 = vpack.c.bf16 %v561_v0, %v559_v49  ;;  %v2077_v45 = vpop.permute.xlu1 %2076  ;;  %v2523_v52 = vpop.permute.xlu0 %2061  ;;  %v1755_v2 = vpack.c.bf16 %v562_v38, %v560_v43  ;;  %v2013_v36 = vunpack.i.l.bf16 %v2390_v16  ;;  %v2018_v16 = vunpack.i.l.bf16 %v2399_v31 }
 0x29f   : > { %v2079_v17 = vunpack.i.h.bf16 %v2077_v45  ;;  %v2078_v7 = vunpack.i.l.bf16 %v2077_v45  ;;  %v2069_v31 = vunpack.i.h.bf16 %v2442_v60  ;;  %v2068_v46 = vunpack.i.l.bf16 %v2442_v60  ;;  %v1693_v60 = vld [vmem:[%s2751_s5 + $0x10] sm:$0xff] }
 0x2a0   : > { %1756 = vmatprep.subr.bf16.mxu0 %v1755_v2  ;;  %v2048_v28 = vunpack.i.l.bf16 %v2444_v25  ;;  %v2063_v45 = vunpack.i.l.bf16 %v2523_v52  ;;  %vm1494_vm4 = vcmask 769024   ;;  %v1827_v18 = vpack.c.bf16 %v2570_v29, %v2485_v58  ;;  %v519_v58 = vld [vmem:[%s2751_s5] sm:$0xff] }
 0x2a1   : > { %v1128_v43 = vsel %vm1121_vm5, %v2034_v32, %v2078_v7  ;;  %v1129_v49 = vsel %vm1121_vm5, %v2078_v7, %v2079_v17  ;;  %1758 = vmatpush1.bf16.msra.mxu0 %v1757_v40  ;;  %v2058_v2 = vunpack.i.l.bf16 %v2425_v59  ;;  %v1253_v32 = vsel %vm1248_vm6, %v2038_v44, %v2013_v36 }
 0x2a2   : > { %v1809_v55 = vpack.c.bf16 %v1129_v49, %v1127_v8  ;;  %v1812_v61 = vpack.c.bf16 %v1128_v43, %v1126_v26  ;;  %v2555_v15 = vpop.permute.xlu1 %2091  ;;  %v2082_v6 = vpop.permute.xlu0 %2081  ;;  %1761 = vmatprep.subr.msk.bf16.mxu0 %vm2534_vm1, %v1759_v22  ;;  %v749_v22 = vsel %vm748_vm7, %v1958_v30, %v1928_v1  ;;  %v2039_v1 = vunpack.i.h.bf16 %v2401_v37 }
 0x2a3   : > { %v2084_v0 = vunpack.i.h.bf16 %v2082_v6  ;;  %v2083_v38 = vunpack.i.l.bf16 %v2082_v6  ;;  %v2064_v37 = vunpack.i.h.bf16 %v2523_v52  ;;  %v1774_v20 = vpack.c.bf16 %v751_v11, %v749_v22 }
 0x2a4   : > { %1811 = vmatprep.subr.msk.bf16.mxu1 %vm2457_vm13, %v1809_v55  ;;  %1683 = vmatmul.mubr.msk.f32.vlgmr.msra.gmra.mrb[8].mxu0 %vm571_vm11, %v1682_v39  ;;  %v2049_v52 = vunpack.i.h.bf16 %v2444_v25  ;;  %v2053_v17 = vunpack.i.l.bf16 %v2495_v9  ;;  %v2770_v7 = vpack.c.bf16 %v2297_v19, %v2303_v21  ;;  %v2059_v12 = vunpack.i.h.bf16 %v2425_v59 }
 0x2a5   : > { %v1256_v62 = vsel %vm1248_vm6, %v2083_v38, %v2084_v0  ;;  %1764 = vmatpush1.bf16.msk.msra.mxu0 %vm2565_vm2, %v1762_v23  ;;  %1814 = vmatpush1.bf16.msk.msra.mxu1 %vm2502_vm15, %v1812_v61  ;;  %v1254_v23 = vsel %vm1248_vm6, %v2013_v36, %v2014_v54  ;;  %v1255_v50 = vsel %vm1248_vm6, %v2039_v1, %v2083_v38  ;;  %v2054_v19 = vunpack.i.h.bf16 %v2495_v9  ;;  %v1725_v38 = vld [vmem:[%s2751_s5 + $0x30] sm:$0xff] }
 0x2a6   : > { %v2601_v40 = vpop.permute.xlu1 %2101  ;;  %v2603_v3 = vpop.permute.xlu0 %2086  ;;  %1767 = vmatprep.subr.msk.bf16.mxu0 %vm2534_vm1, %v2769_v5  ;;  %1817 = vmatprep.subr.msk.bf16.mxu1 %vm2534_vm1, %v1815_v35  ;;  %v1821_v10 = vpack.c.bf16 %v1256_v62, %v1254_v23  ;;  %v754_v35 = vsel %vm748_vm7, %v2018_v16, %v2019_v53  ;;  %v879_v25 = vsel %vm875_vm3, %v2068_v46, %v2069_v31  ;;  %v2094_v6 = vunpack.i.h.bf16 %v2555_v15 }
 0x2a7   : > { %713 = vmatprep.mubr.f32.mxu0 %v2156_v4  ;;  %v2643_v34 = vsel %vm1377_vm8, %v2058_v2, %v2048_v28  ;;  %v877_v59 = vsel %vm875_vm3, %v2063_v45, %v2064_v37  ;;  %v1824_v30 = vpack.c.bf16 %v1255_v50, %v1253_v32  ;;  %v2089_v9 = vunpack.i.h.bf16 %v2603_v3 }
 0x2a8   : > { %1724 = vmatmul.mubr.msk.f32.vlgmr.msra.gmra.mrb[0].mxu1 %vm571_vm11, %v1715_v47  ;;  %v2088_v43 = vunpack.i.l.bf16 %v2603_v3  ;;  %v753_v42 = vsel %vm748_vm7, %v2053_v17, %v2018_v16  ;;  %v1383_v55 = vsel %vm1377_vm8, %v2048_v28, %v2049_v52  ;;  %v1783_v61 = vpack.c.bf16 %v879_v25, %v877_v59  ;;  %v1735_v17 = vld [vmem:[%s2751_s5 + $0x38] sm:$0xff] }
 0x2a9   : > { %1770 = vmatpush1.bf16.msk.msra.mxu0 %vm2565_vm2, %v2770_v7  ;;  %1820 = vmatpush1.bf16.msk.msra.mxu1 %vm2565_vm2, %v1818_v63  ;;  %v2093_v63 = vunpack.i.l.bf16 %v2555_v15  ;;  %v2104_v11 = vunpack.i.h.bf16 %v2601_v40  ;;  %v2103_v16 = vunpack.i.l.bf16 %v2601_v40 }
 0x2aa   : > { %v2117_v21 = vpop.permute.xlu1 %2116  ;;  %v2097_v41 = vpop.permute.xlu0 %2096  ;;  %1773 = vmatprep.subr.msk.bf16.mxu0 %vm2457_vm13, %v1771_v13  ;;  %1823 = vmatprep.subr.msk.bf16.mxu1 %vm2534_vm1, %v1821_v10  ;;  %v1496_v44 = vsel %vm1494_vm4, %v2088_v43, %v2089_v9 }
 0x2ab   : > { %v2119_v8 = vunpack.i.h.bf16 %v2117_v21  ;;  %v2118_v26 = vunpack.i.l.bf16 %v2117_v21  ;;  %1342 = vmatprep.mubr.f32.mxu1 %v2156_v4  ;;  %v2099_v49 = vunpack.i.h.bf16 %v2097_v41  ;;  %v2098_v39 = vunpack.i.l.bf16 %v2097_v41 }
 0x2ac   : > { %1692 = vmatmul.mubr.msk.f32.vlgmr.msra.gmra.mrb[8].mxu0 %vm571_vm11, %v519_v58  ;;  %v1498_v23 = vsel %vm1494_vm4, %v2093_v63, %v2094_v6  ;;  %v1495_v2 = vsel %vm1494_vm4, %v2103_v16, %v2088_v43  ;;  %v1703_v43 = vld [vmem:[%s2751_s5 + $0x18] sm:$0xff] }
 0x2ad   : > { %v755_v57 = vsel %vm748_vm7, %v2054_v19, %v2118_v26  ;;  %v756_v13 = vsel %vm748_vm7, %v2118_v26, %v2119_v8  ;;  %1776 = vmatpush1.bf16.msk.msra.mxu0 %vm2502_vm15, %v1774_v20  ;;  %1826 = vmatpush1.bf16.msk.msra.mxu1 %vm2565_vm2, %v1824_v30  ;;  %v878_v62 = vsel %vm875_vm3, %v2099_v49, %v2068_v46 }
 0x2ae   : > { %v1777_v29 = vpack.c.bf16 %v756_v13, %v754_v35  ;;  %v1780_v54 = vpack.c.bf16 %v755_v57, %v753_v42  ;;  %v2122_v36 = vpop.permute.xlu1 %2121  ;;  %v2107_v0 = vpop.permute.xlu0 %2106  ;;  %842 = vmatprep.mubr.f32.mxu0 %v2156_v4  ;;  %1828 = vmatprep.subr.bf16.mxu1 %v1827_v18  ;;  %v876_v47 = vsel %vm875_vm3, %v2098_v39, %v2063_v45 }
 0x2af   : > { %v2124_v22 = vunpack.i.h.bf16 %v2122_v36  ;;  %v2123_v53 = vunpack.i.l.bf16 %v2122_v36  ;;  %v2109_v1 = vunpack.i.h.bf16 %v2107_v0  ;;  %v2108_v31 = vunpack.i.l.bf16 %v2107_v0 }
 0x2b0   : > { %1779 = vmatprep.subr.msk.bf16.mxu0 %vm2457_vm13, %v1777_v29  ;;  %1734 = vmatmul.mubr.msk.f32.vlgmr.msra.gmra.mrb[0].mxu1 %vm571_vm11, %v1725_v38  ;;  %v1786_v37 = vpack.c.bf16 %v878_v62, %v876_v47  ;;  %v1497_v20 = vsel %vm1494_vm4, %v2104_v11, %v2093_v63  ;;  %v1835_v50 = vpack.c.bf16 %v1498_v23, %v1496_v44 }
 0x2b1   : > { %v1384_v15 = vsel %vm1377_vm8, %v2059_v12, %v2123_v53  ;;  %1782 = vmatpush1.bf16.msk.msra.mxu0 %vm2502_vm15, %v1780_v54  ;;  %v1385_v28 = vsel %vm1377_vm8, %v2123_v53, %v2124_v22  ;;  %1830 = vmatpush1.bf16.msra.mxu1 %v1829_v56  ;;  %v881_v33 = vsel %vm875_vm3, %v2108_v31, %v2109_v1 }
 0x2b2   : > { %v1833_v46 = vpack.c.bf16 %v1384_v15, %v2643_v34  ;;  %v2127_v40 = vpop.permute.xlu1 %2126  ;;  %v2112_v3 = vpop.permute.xlu0 %2111  ;;  %1785 = vmatprep.subr.msk.bf16.mxu0 %vm2534_vm1, %v1783_v61  ;;  %v1831_v5 = vpack.c.bf16 %v1385_v28, %v1383_v55  ;;  %1461 = vmatprep.mubr.f32.mxu1 %v2156_v4  ;;  %v1838_v34 = vpack.c.bf16 %v1497_v20, %v1495_v2  ;;  %v2146_v61 = vld [vmem:[%s2237_s14] sm:$0xff] }
 0x2b3   : > { %v2129_v45 = vunpack.i.h.bf16 %v2127_v40  ;;  %v2128_v18 = vunpack.i.l.bf16 %v2127_v40  ;;  %v2114_v56 = vunpack.i.h.bf16 %v2112_v3  ;;  %v2113_v10 = vunpack.i.l.bf16 %v2112_v3 }
 0x2b4   : > { %1832 = vmatprep.subr.bf16.mxu1 %v1831_v5  ;;  %1702 = vmatmul.mubr.msk.f32.vlgmr.msra.gmra.mrb[8].mxu0 %vm571_vm11, %v1693_v60  ;;  %v1598_v6 = vcombine.high %v2146_v61, %v2146_v61 }
 0x2b5   : > { %v883_v48 = vsel %vm875_vm3, %v2128_v18, %v2129_v45  ;;  %1788 = vmatpush1.bf16.msk.msra.mxu0 %vm2565_vm2, %v1786_v37  ;;  %969 = vmatprep.mubr.f32.mxu0 %v2156_v4  ;;  %v1500_v19 = vsel %vm1494_vm4, %v2113_v10, %v2114_v56 }
 0x2b6   : > { %v1789_v35 = vpack.c.bf16 %v883_v48, %v881_v33  ;;  %1834 = vmatpush1.bf16.msra.mxu1 %v1833_v46  ;;  %v2132_v32 = vpop.permute.xlu1 %2131  ;;  %v2137_v52 = vpop.permute.xlu0 %2136 }
 0x2b7   : > { %v2134_v7 = vunpack.i.h.bf16 %v2132_v32  ;;  %v2133_v58 = vunpack.i.l.bf16 %v2132_v32  ;;  %v2139_v12 = vunpack.i.h.bf16 %v2137_v52  ;;  %v2138_v25 = vunpack.i.l.bf16 %v2137_v52  ;;  %1837 = vmatprep.subr.msk.bf16.mxu1 %vm2457_vm13, %v1835_v50 }
 0x2b8   : > { %1791 = vmatprep.subr.msk.bf16.mxu0 %vm2534_vm1, %v1789_v35 }
 0x2b9   : > { %v1502_v21 = vsel %vm1494_vm4, %v2133_v58, %v2134_v7  ;;  %v882_v41 = vsel %vm875_vm3, %v2139_v12, %v2128_v18  ;;  %v880_v59 = vsel %vm875_vm3, %v2138_v25, %v2108_v31  ;;  %1736 = vmatmul.mubr.msk.f32.vlgmr.msra.gmra.mrb[0].mxu1 %vm571_vm11, %v1735_v17 }
 0x2ba   : > { %v1841_v30 = vpack.c.bf16 %v1502_v21, %v1500_v19  ;;  %v1792_v8 = vpack.c.bf16 %v882_v41, %v880_v59  ;;  %1840 = vmatpush1.bf16.msk.msra.mxu1 %vm2502_vm15, %v1838_v34  ;;  %v2142_v26 = vpop.permute.xlu1 %2141  ;;  %1588 = vmatprep.mubr.f32.mxu1 %v2156_v4  ;;  %v1737_v4 = vld [vmem:[%s2751_s5 + $0x40] sm:$0xff] }
 0x2bb   : > { %v2144_v14 = vunpack.i.h.bf16 %v2142_v26  ;;  %v2143_v9 = vunpack.i.l.bf16 %v2142_v26 }
 0x2bc   : > { %1794 = vmatpush1.bf16.msk.msra.mxu0 %vm2565_vm2, %v1792_v8  ;;  %1843 = vmatprep.subr.msk.bf16.mxu1 %vm2457_vm13, %v1841_v30 }
 0x2bd   : > { %v1499_v49 = vsel %vm1494_vm4, %v2143_v9, %v2113_v10  ;;  %v1501_v39 = vsel %vm1494_vm4, %v2144_v14, %v2133_v58 }
 0x2be   : > { %v1844_v42 = vpack.c.bf16 %v1501_v39, %v1499_v49 }
 0x2bf   : > { %1712 = vmatmul.mubr.msk.f32.vlgmr.msra.gmra.mrb[8].mxu0 %vm571_vm11, %v1703_v43 }
 0x2c0   : > { %1846 = vmatpush1.bf16.msk.msra.mxu1 %vm2502_vm15, %v1844_v42 }
 0x2c3   : > { %1746 = vmatmul.mubr.msk.f32.vlgmr.msra.gmra.mrb[0].mxu1 %vm571_vm11, %v1737_v4 }
 0x392   : > { %v971_v51 = vpop.f32.mrb[8].mxu0 }
 0x393   : > { %v973_v27 = vpop.f32.mrb[9].mxu0 }
 0x396   : > { %v1590_v57 = vpop.f32.mrb[0].mxu1 }
 0x397   : > { %v1847_v13 = vadd.f32 %v1590_v57, %v971_v51  ;;  %v1592_v55 = vpop.f32.mrb[1].mxu1 }
 0x398   : > { %v1848_v24 = vadd.f32 %v1592_v55, %v973_v27 }
 0x399   : > { %v1602_v29 = vrot.slane %v1847_v13, 4 }
 0x39a   : > { %v1603_v54 = vrot.slane %v1848_v24, 4 }
 0x39b   : > { %v1606_v36 = vsel %vm325_vm0, %v2146_v61, %v1602_v29  ;;  %1610 = vst [vmem:[%s251_s10 + $0x10] sm:$0xf] %v1602_v29 }
 0x39c   : > { %1608 = vst [vmem:[%s251_s10] sm:$0xff] %v1606_v36  ;;  %v1607_v0 = vsel %vm325_vm0, %v1598_v6, %v1603_v54  ;;  %1611 = vst [vmem:[%s251_s10 + $0x18] sm:$0xf] %v1603_v54 }
 0x39d   : > { %1609 = vst [vmem:[%s251_s10 + $0x8] sm:$0xff] %v1607_v0 }
 0x39e PF: > { %s16_s21 = sadd.s32 1, %s2153_s21  }
 0x39f   : > { %p13_p4 = scmp.ge.s32.totalorder %s16_s21, 4  }
 0x3a1   :  { %15 = sbr.rel (!%p13_p4) target bundleno = 1 (0x1), region = 82 }

</bundles_post_ra>
